<compile_context>
chip_gen: v5e
topology: v5e:2x2
jax: 0.10.0
libtpu: 0.0.40
codegen_flags: <defaults>
</compile_context>

<pallas_src>
import functools

import jax
import jax.numpy as jnp
from jax.experimental import pallas as pl
from jax.experimental.pallas import tpu as pltpu


# ----------------------------------------------------------------------------
# Tiling helpers
# ----------------------------------------------------------------------------
def _round_up(x, m):
    return ((x + m - 1) // m) * m


def _choose_tile_b(batch, num_classes):
    """Batch tile sized by the lane-padded f32 footprint (~4 MiB per block)."""
    lane_c = _round_up(max(int(num_classes), 1), 128)
    bytes_per_row = lane_c * 4                     # f32 compute working set
    target_block_bytes = 4 * 1024 * 1024
    rows = max(32, target_block_bytes // bytes_per_row)
    rows = min(rows, 8192)
    rows = max(32, (rows // 32) * 32)              # 32: safe sublane multiple for f32/bf16/i8
    rows = min(rows, _round_up(batch, 32))         # never (much) bigger than the batch
    return int(max(rows, 32))


def _vmem_limit_bytes(tile_b, num_classes):
    lane_c = _round_up(max(int(num_classes), 1), 128)
    logits_block = tile_b * lane_c * 4
    # 2x double-buffered logits + f32 upcast temporaries + side inputs/outputs.
    limit = 4 * logits_block + 4 * 1024 * 1024
    return int(min(max(limit, 16 * 1024 * 1024), 48 * 1024 * 1024))


def _compiler_params(semantics, vmem_limit):
    return pltpu.CompilerParams(
        dimension_semantics=semantics,
        vmem_limit_bytes=vmem_limit,
    )


# ----------------------------------------------------------------------------
# Kernels
# ----------------------------------------------------------------------------
def _log_sum_exp(logits):
    m = jnp.max(logits, axis=-1, keepdims=True)
    return jnp.log(jnp.sum(jnp.exp(logits - m), axis=-1, keepdims=True)) + m


def _per_sample_ce_kernel(logits_ref, labels_ref, loss_ref):
    """Cross-entropy with reduction='none'.  loss block: (TILE_B, 1) f32."""
    logits = logits_ref[...].astype(jnp.float32)             # (TILE_B, C)
    tb, c = logits.shape
    class_ids = jax.lax.broadcasted_iota(jnp.int32, (tb, c), 1)
    tgt = jnp.sum(jnp.where(class_ids == labels_ref[...], logits, 0.0),
                  axis=-1, keepdims=True)                     # (TILE_B, 1)
    loss_ref[...] = _log_sum_exp(logits) - tgt
    # OOB rows of the edge block are dropped by the masked writeback.


def _mixup_ce_kernel(logits_ref, y_ref, out_ref, *, batch_size, needs_mask):
    """Mixed CE, mean-reduced into a resident (1, 1) output accumulator."""
    i = pl.program_id(0)

    @pl.when(i == 0)
    def _():
        out_ref[...] = jnp.zeros_like(out_ref)

    logits = logits_ref[...].astype(jnp.float32)              # (TILE_B, C)
    tb, c = logits.shape
    ya = y_ref[:, 0:1].astype(jnp.int32)                      # (TILE_B, 1)
    yb = y_ref[:, 1:2].astype(jnp.int32)                      # (TILE_B, 1)
    lam = y_ref[:, 2:3].astype(jnp.float32)                   # (TILE_B, 1)

    # Two masked-select reductions; mixup weights applied on the tiny
    # (TILE_B, 1) partials -> fewer VALU ops/element, correct for ya == yb.
    class_ids = jax.lax.broadcasted_iota(jnp.int32, (tb, c), 1)
    tgt_a = jnp.sum(jnp.where(class_ids == ya, logits, 0.0),
                    axis=-1, keepdims=True)                   # logit[ya]
    tgt_b = jnp.sum(jnp.where(class_ids == yb, logits, 0.0),
                    axis=-1, keepdims=True)                   # logit[yb]

    lse = _log_sum_exp(logits)                                # (TILE_B, 1)
    # (1-lam)*(lse - tgt_a) + lam*(lse - tgt_b)
    mixed = lse - ((1.0 - lam) * tgt_a + lam * tgt_b)

    if needs_mask:  # static: only when B % TILE_B != 0 (edge block has garbage rows)
        row_ids = i * tb + jax.lax.broadcasted_iota(jnp.int32, (tb, 1), 0)
        mixed = jnp.where(row_ids < batch_size, mixed, 0.0)

    out_ref[...] += jnp.sum(mixed, axis=0, keepdims=True)

    @pl.when(i == pl.num_programs(0) - 1)
    def _():
        out_ref[...] = out_ref[...] / jnp.float32(batch_size)


# ----------------------------------------------------------------------------
# Wrappers
# ----------------------------------------------------------------------------
def per_sample_cross_entropy(logits, labels, tile_b=None):
    """criterion(logits, labels) with reduction='none'  ->  (B,) float32."""
    B, C = logits.shape
    itemsize = jnp.dtype(logits.dtype).itemsize
    if tile_b is None:
        tile_b = _choose_tile_b(B, C)
    else:
        tile_b = max(8, _round_up(int(tile_b), 8))
    n_tiles = pl.cdiv(B, tile_b)

    labels2d = labels.astype(jnp.int32).reshape(B, 1)         # tiny side input
    cost = pl.CostEstimate(
        flops=int(6 * B * C),
        transcendentals=int(B * C + B),
        bytes_accessed=int(B * C * itemsize + B * 4 + B * 4),
    )

    out = pl.pallas_call(
        _per_sample_ce_kernel,
        out_shape=jax.ShapeDtypeStruct((B, 1), jnp.float32),
        grid=(n_tiles,),
        in_specs=[
            pl.BlockSpec((tile_b, C), lambda i: (i, 0)),
            pl.BlockSpec((tile_b, 1), lambda i: (i, 0)),
        ],
        out_specs=pl.BlockSpec((tile_b, 1), lambda i: (i, 0)),
        compiler_params=_compiler_params(("parallel",), _vmem_limit_bytes(tile_b, C)),
        cost_estimate=cost,
    )(logits, labels2d)
    return out[:, 0]


def mixup_cross_entropy(logits, y, tile_b=None):
    """Training branch: y is (B, 3) = [label_a, label_b, lam]. Returns scalar."""
    B, C = logits.shape
    itemsize = jnp.dtype(logits.dtype).itemsize
    if tile_b is None:
        tile_b = _choose_tile_b(B, C)
    else:
        tile_b = max(8, _round_up(int(tile_b), 8))
    n_tiles = pl.cdiv(B, tile_b)
    needs_mask = (B % tile_b) != 0

    # One small (B, 3) f32 side input -> one DMA stream (labels exact for ids < 2^24).
    y_f32 = y.astype(jnp.float32)
    kernel = functools.partial(_mixup_ce_kernel, batch_size=B, needs_mask=needs_mask)
    cost = pl.CostEstimate(
        flops=int(8 * B * C),
        transcendentals=int(B * C + B),
        bytes_accessed=int(B * C * itemsize + B * 3 * 4 + 4),
    )

    out = pl.pallas_call(
        kernel,
        out_shape=jax.ShapeDtypeStruct((1, 1), jnp.float32),
        grid=(n_tiles,),
        in_specs=[
            pl.BlockSpec((tile_b, C), lambda i: (i, 0)),
            pl.BlockSpec((tile_b, 3), lambda i: (i, 0)),
        ],
        # Same (1,1) block every grid step -> resident VMEM accumulator
        # (reduction axis -> "arbitrary").
        out_specs=pl.BlockSpec((1, 1), lambda i: (0, 0)),
        compiler_params=_compiler_params(("arbitrary",), _vmem_limit_bytes(tile_b, C)),
        cost_estimate=cost,
    )(logits, y_f32)
    return out[0, 0]


class MixupLoss:
    """JAX/Pallas port of the PyTorch MixupLoss (criterion = CE, reduction='none')."""

    def __init__(self):
        self.training = False

    def __call__(self, logits, y):
        if self.training:
            return mixup_cross_entropy(logits, y)
        else:
            return per_sample_cross_entropy(logits, y)


# ----------------------------------------------------------------------------
# Reference (plain JAX) for a sanity check
# ----------------------------------------------------------------------------
def _ref_per_sample_ce(logits, labels):
    logp = jax.nn.log_softmax(logits.astype(jnp.float32), axis=-1)
    return -jnp.take_along_axis(logp, labels.astype(jnp.int32)[:, None], axis=-1)[:, 0]


def _ref_mixup(logits, y):
    la = _ref_per_sample_ce(logits, y[:, 0])
    lb = _ref_per_sample_ce(logits, y[:, 1])
    lam = y[:, 2].astype(jnp.float32)
    return jnp.mean((1.0 - lam) * la + lam * lb)


if __name__ == "__main__":
    key = jax.random.PRNGKey(0)
    B, C = 20, 32           # B not a multiple of 8/tile -> exercises edge-block masking
    k1, k2, k3, k4 = jax.random.split(key, 4)

    logits = jax.random.normal(k1, (B, C), dtype=jnp.float32)
    labels_a = jax.random.randint(k2, (B,), 0, C)
    labels_b = jax.random.randint(k3, (B,), 0, C)
    lam = jax.random.uniform(k4, (B,), dtype=jnp.float32)
    # y as in the PyTorch module: (B, 3) = [label_a, label_b, lam]
    y_train = jnp.stack(
        [labels_a.astype(jnp.float32), labels_b.astype(jnp.float32), lam], axis=1
    )

    loss_mod = MixupLoss()

    # --- eval branch (auto tile: single block) ---
    loss_mod.training = False
    eval_loss = jax.block_until_ready(loss_mod(logits, labels_a))
    ref_eval = _ref_per_sample_ce(logits, labels_a)
    assert jnp.allclose(eval_loss, ref_eval, atol=1e-5, rtol=1e-5)

    # --- eval branch (forced multi-tile grid, edge block) ---
    eval_loss_mt = jax.block_until_ready(
        per_sample_cross_entropy(logits, labels_a, tile_b=8))
    assert jnp.allclose(eval_loss_mt, ref_eval, atol=1e-5, rtol=1e-5)

    # --- training (mixup) branch (auto tile) ---
    loss_mod.training = True
    train_loss = jax.block_until_ready(loss_mod(logits, y_train))
    ref_train = _ref_mixup(logits, y_train)
    assert jnp.allclose(train_loss, ref_train, atol=1e-5, rtol=1e-5)

    # --- training branch (forced multi-tile grid, accumulator + edge mask) ---
    train_loss_mt = jax.block_until_ready(
        mixup_cross_entropy(logits, y_train, tile_b=8))
    assert jnp.allclose(train_loss_mt, ref_train, atol=1e-5, rtol=1e-5)

    # --- bf16 logits stay bf16 through the DMA, upcast in-kernel only ---
    logits_bf16 = logits.astype(jnp.bfloat16)
    eval_bf16 = jax.block_until_ready(per_sample_cross_entropy(logits_bf16, labels_a))
    ref_eval_bf16 = _ref_per_sample_ce(logits_bf16, labels_a)
    assert jnp.allclose(eval_bf16, ref_eval_bf16, atol=1e-3, rtol=1e-3)
    train_bf16 = jax.block_until_ready(mixup_cross_entropy(logits_bf16, y_train))
    ref_train_bf16 = _ref_mixup(logits_bf16, y_train)
    assert jnp.allclose(train_bf16, ref_train_bf16, atol=1e-3, rtol=1e-3)

    print("KERNEL_OK")
</pallas_src>

<mosaic_0001>
module attributes {stable_mosaic.version = 11 : i64} {
  func.func @_per_sample_ce_kernel(%arg0: i32, %arg1: memref<32x32xf32, #tpu.memory_space<vmem>>, %arg2: memref<32x1xi32, #tpu.memory_space<vmem>>, %arg3: memref<32x1xf32, #tpu.memory_space<vmem>>) attributes {dimension_semantics = [#tpu.dimension_semantics<parallel>], iteration_bounds = array<i64: 1>, scalar_prefetch = 0 : i64, scratch_operands = 0 : i64, tpu.core_type = #tpu.core_type<tc>, window_params = [{transform_indices = @transform_0, window_bounds = array<i64: 32, 32>}, {transform_indices = @transform_1, window_bounds = array<i64: 32, 1>}, {transform_indices = @transform_2, window_bounds = array<i64: 32, 1>}]} {
    %c0 = arith.constant 0 : index
    %c0_0 = arith.constant 0 : index
    %0 = vector.load %arg1[%c0, %c0_0] : memref<32x32xf32, #tpu.memory_space<vmem>>, vector<32x32xf32>
    %1 = tpu.iota {dimensions = array<i32: 1>} : vector<32x32xi32>
    %c0_1 = arith.constant 0 : index
    %c0_2 = arith.constant 0 : index
    %2 = vector.load %arg2[%c0_1, %c0_2] : memref<32x1xi32, #tpu.memory_space<vmem>>, vector<32x1xi32>
    %3 = vector.broadcast %2 : vector<32x1xi32> to vector<32x32xi32>
    %4 = arith.cmpi eq, %1, %3 : vector<32x32xi32>
    %cst = arith.constant 0.000000e+00 : f32
    %5 = vector.broadcast %cst : f32 to vector<32x32xf32>
    %6 = arith.select %4, %0, %5 : vector<32x32xi1>, vector<32x32xf32>
    %cst_3 = arith.constant dense<0.000000e+00> : vector<32xf32>
    %7 = vector.multi_reduction <add>, %6, %cst_3 [1] : vector<32x32xf32> to vector<32xf32>
    %8 = vector.shape_cast %7 : vector<32xf32> to vector<32x1xf32>
    %cst_4 = arith.constant dense<0xFF800000> : vector<32xf32>
    %9 = vector.multi_reduction <maximumf>, %0, %cst_4 [1] : vector<32x32xf32> to vector<32xf32>
    %10 = vector.shape_cast %9 : vector<32xf32> to vector<32x1xf32>
    %11 = vector.broadcast %10 : vector<32x1xf32> to vector<32x32xf32>
    %12 = arith.subf %0, %11 : vector<32x32xf32>
    %13 = math.exp %12 : vector<32x32xf32>
    %cst_5 = arith.constant dense<0.000000e+00> : vector<32xf32>
    %14 = vector.multi_reduction <add>, %13, %cst_5 [1] : vector<32x32xf32> to vector<32xf32>
    %15 = vector.shape_cast %14 : vector<32xf32> to vector<32x1xf32>
    %16 = math.log %15 : vector<32x1xf32>
    %17 = arith.addf %16, %10 : vector<32x1xf32>
    %18 = arith.subf %17, %8 : vector<32x1xf32>
    %c0_6 = arith.constant 0 : index
    %c0_7 = arith.constant 0 : index
    %19 = vector.load %arg3[%c0_6, %c0_7] : memref<32x1xf32, #tpu.memory_space<vmem>>, vector<32x1xf32>
    tpu.vector_store %arg3[%c0_6, %c0_7], %18 {strides = array<i32>} : memref<32x1xf32, #tpu.memory_space<vmem>>, vector<32x1xf32>,
    return
  }
  func.func @transform_0(%arg0: i32) -> (i32, i32) {
    %c0_i32 = arith.constant 0 : i32
    %c0_i32_0 = arith.constant 0 : i32
    return %arg0, %c0_i32 : i32, i32
  }
  func.func @transform_1(%arg0: i32) -> (i32, i32) {
    %c0_i32 = arith.constant 0 : i32
    %c0_i32_0 = arith.constant 0 : i32
    return %arg0, %c0_i32 : i32, i32
  }
  func.func @transform_2(%arg0: i32) -> (i32, i32) {
    %c0_i32 = arith.constant 0 : i32
    %c0_i32_0 = arith.constant 0 : i32
    return %arg0, %c0_i32 : i32, i32
  }
}

</mosaic_0001>

<bundles_post_ra>
// kernel: tpu_custom_call.1
= control target key start
LH: loop header
LB: loop body
LE: loop exit
PB: predicated region body
PF: predicated region fallthrough
CT: control target
= control target key end

     0   :  { %vm41_vm0 = vcmask 261120   ;;  %v180_v4 = vmov 0   ;;  %v15_v19 = vlaneseq  ;;  %vm106_vm5 = vcmask 7168   ;;  %s253_s0 = inlined_call_operand.vmem [shape: f32[20,32], index: 0, kind: input, shape index: {}]   ;;  %s254_s1 = inlined_call_operand.vmem [shape: s32[20,1], index: 1, kind: input, shape index: {}]   ;;  %s255_s2 = inlined_call_operand.vmem [shape: f32[20,1], index: 2, kind: output, shape index: {}]  }
   0x1   :  { %v199_v0 = vld [vmem:[%s253_s0 + $0x10] sm:$0xff]  ;;  %v11_v1 = vld [vmem:[%s253_s0] sm:$0xff]  ;;  %161 = vset.pattern.permute.xlu2 %v180_v4  ;;  %162 = vset.pattern.permute.xlu0 %v180_v4  ;;  %v12_v6 = vld [vmem:[%s253_s0 + $0x8] sm:$0xff] }
   0x2   :  { %v60_v2 = vsel %vm41_vm0, %v199_v0, -inf  ;;  %v54_v3 = vsel %vm41_vm0, %v11_v1, -inf  ;;  %v17_v5 = vld [vmem:[%s254_s1] sm:$0xff]  ;;  %163 = vset.pattern.permute.xlu1 %v180_v4  ;;  %v14_v7 = vld [vmem:[%s253_s0 + $0x18] sm:$0xff]  ;;  %v57_v8 = vsel %vm41_vm0, %v12_v6, -inf  ;;  %v18_v10 = vld [vmem:[%s254_s1 + $0x8] sm:$0xff] }
   0x3   :  { %61 = vmax.xlane.f32.xlu1 %v60_v2  ;;  %55 = vmax.xlane.f32.xlu0 %v54_v3  ;;  %v63_v9 = vsel %vm41_vm0, %v14_v7, -inf  ;;  %v19_v11 = vld [vmem:[%s254_s1 + $0x10] sm:$0xff]  ;;  %v20_v12 = vld [vmem:[%s254_s1 + $0x18] sm:$0xff]  ;;  %v16_v22 = vand.u32 127, %v15_v19 }
   0x4   :  { %22 = vperm.xlu2 %161, %v17_v5  }
   0xb   :  { %58 = vmax.xlane.f32.xlu0 %v57_v8  ;;  %64 = vmax.xlane.f32.xlu1 %v63_v9 }
   0xc   :  { %25 = vperm.xlu2 %161, %v18_v10  }
  0x1f   :  { %28 = vperm.xlu0 %162, %v19_v11  }
  0x24   :  { %31 = vperm.xlu1 %163, %v20_v12  }
  0x5e   :  { %v23_v23 = vpop.permute.xlu2 %22 }
  0x5f   :  { %vm33_vm1 = vcmp.eq.s32.totalorder %v16_v22, %v23_v23 }
  0x60   :  { %v37_v30 = vsel %vm33_vm1, %v11_v1, 0.0 }
  0x61   :  { %v42_v33 = vsel %vm41_vm0, %v37_v30, 0.0 }
  0x66   :  { %v26_v34 = vpop.permute.xlu2 %25 }
  0x67   :  { %vm34_vm2 = vcmp.eq.s32.totalorder %v16_v22, %v26_v34 }
  0x68   :  { %v38_v37 = vsel %vm34_vm2, %v12_v6, 0.0 }
  0x69   :  { %v45_v38 = vsel %vm41_vm0, %v38_v37, 0.0 }
  0x76   :  { %v227_v13 = vpop.xlane.xlu1 %61  ;;  %v56_v14 = vpop.xlane.xlu0 %55 }
  0x77   :  { %v68_v15 = vsub.f32 %v199_v0, %v227_v13  ;;  %v66_v16 = vsub.f32 %v11_v1, %v56_v14 }
  0x79   :  { %v74_v17 = vmul.f32 1.442695, %v68_v15  ;;  %v70_v18 = vmul.f32 1.442695, %v66_v16 }
  0x7b   :  { %164 = vpow2.f32 %v74_v17 }
  0x7c   :  { %166 = vpow2.f32 %v70_v18 }
  0x7e   :  { %v59_v20 = vpop.xlane.xlu0 %58  ;;  %v65_v29 = vpop.xlane.xlu1 %64 }
  0x7f   :  { %v67_v21 = vsub.f32 %v12_v6, %v59_v20  ;;  %v69_v31 = vsub.f32 %v14_v7, %v65_v29 }
  0x81   :  { %v165_v24 = vpop.eup %164  ;;  %v72_v25 = vmul.f32 1.442695, %v67_v21  ;;  %v76_v36 = vmul.f32 1.442695, %v69_v31 }
  0x82   :  { %v167_v26 = vpop.eup %166  ;;  %v84_v27 = vsel %vm41_vm0, %v165_v24, 0.0 }
  0x83   :  { %168 = vpow2.f32 %v72_v25  ;;  %85 = vadd.xlane.f32.xlu0 %v84_v27  ;;  %v78_v28 = vsel %vm41_vm0, %v167_v26, 0.0 }
  0x84   :  { %79 = vadd.xlane.f32.xlu2 %v78_v28  ;;  %170 = vpow2.f32 %v76_v36 }
  0x89   :  { %v169_v32 = vpop.eup %168 }
  0x8a   :  { %v81_v35 = vsel %vm41_vm0, %v169_v32, 0.0  ;;  %v171_v39 = vpop.eup %170 }
  0x8b   :  { %82 = vadd.xlane.f32.xlu1 %v81_v35  ;;  %v87_v43 = vsel %vm41_vm0, %v171_v39, 0.0 }
  0x8c   :  { %43 = vadd.xlane.f32.xlu2 %v42_v33 }
  0x91   :  { %v29_v41 = vpop.permute.xlu0 %28 }
  0x92   :  { %vm35_vm4 = vcmp.eq.s32.totalorder %v16_v22, %v29_v41 }
  0x93   :  { %v39_v45 = vsel %vm35_vm4, %v199_v0, 0.0 }
  0x94   :  { %46 = vadd.xlane.f32.xlu2 %v45_v38  ;;  %v48_v46 = vsel %vm41_vm0, %v39_v45, 0.0 }
  0x96   :  { %v32_v40 = vpop.permute.xlu1 %31 }
  0x97   :  { %vm36_vm3 = vcmp.eq.s32.totalorder %v16_v22, %v32_v40 }
  0x98   :  { %v40_v42 = vsel %vm36_vm3, %v14_v7, 0.0 }
  0x99   :  { %v51_v44 = vsel %vm41_vm0, %v40_v42, 0.0 }
  0x9a   :  { %52 = vadd.xlane.f32.xlu1 %v51_v44 }
  0x9c   :  { %88 = vadd.xlane.f32.xlu2 %v87_v43 }
  0xa4   :  { %49 = vadd.xlane.f32.xlu2 %v48_v46 }
  0xf6   :  { %v86_v55 = vpop.xlane.xlu0 %85 }
  0xf7   :  { %v80_v47 = vpop.xlane.xlu2 %79 }
  0xf8   :  { %172 = vlog2.f32 %v80_v47 }
  0xfe   :  { %v173_v48 = vpop.eup %172  ;;  %v83_v49 = vpop.xlane.xlu1 %82 }
  0xff   :  { %v91_v50 = vmul.f32 0.6931472, %v173_v48  ;;  %174 = vlog2.f32 %v83_v49  ;;  %v44_v51 = vpop.xlane.xlu2 %43 }
 0x100   :  { %176 = vlog2.f32 %v86_v55 }
 0x101   :  { %v98_v52 = vadd.f32 %v91_v50, %v56_v14 }
 0x103   :  { %v102_v53 = vsub.f32 %v98_v52, %v44_v51 }
 0x105   :  { %v175_v54 = vpop.eup %174  ;;  %107 = vst.msk [vmem:[#allocation2] sm:$0xff] %vm106_vm5, %v102_v53 }
 0x106   :  { %v93_v56 = vmul.f32 0.6931472, %v175_v54  ;;  %v177_v61 = vpop.eup %176 }
 0x107   :  { %v47_v57 = vpop.xlane.xlu2 %46  ;;  %v95_v63 = vmul.f32 0.6931472, %v177_v61 }
 0x108   :  { %v99_v58 = vadd.f32 %v93_v56, %v59_v20 }
 0x109   :  { %v100_v2 = vadd.f32 %v95_v63, %v227_v13 }
 0x10a   :  { %v103_v59 = vsub.f32 %v99_v58, %v47_v57 }
 0x10c   :  { %v145_v60 = vld [vmem:[#allocation2] sm:$0xff]  ;;  %108 = vst.msk [vmem:[#allocation2 + $0x8] sm:$0xff] %vm106_vm5, %v103_v59 }
 0x10d   :  { %146 = vst [vmem:[%s255_s2] sm:$0xff] %v145_v60  ;;  %v53_v5 = vpop.xlane.xlu1 %52 }
 0x10f   :  { %v89_v62 = vpop.xlane.xlu2 %88 }
 0x110   :  { %178 = vlog2.f32 %v89_v62 }
 0x113   :  { %v147_v0 = vld [vmem:[#allocation2 + $0x8] sm:$0xff] }
 0x114   :  { %148 = vst [vmem:[%s255_s2 + $0x8] sm:$0xff] %v147_v0 }
 0x116   :  { %v179_v1 = vpop.eup %178 }
 0x117   :  { %v50_v3 = vpop.xlane.xlu2 %49 }
 0x118   :  { %v104_v4 = vsub.f32 %v100_v2, %v50_v3 }
 0x11a   :  { %109 = vst.msk [vmem:[#allocation2 + $0x10] sm:$0xff] %vm106_vm5, %v104_v4 }
 0x121   :  { %v149_v6 = vld [vmem:[#allocation2 + $0x10] sm:$0xff] }
 0x122   :  { %150 = vst [vmem:[%s255_s2 + $0x10] sm:$0xff] %v149_v6 }

</bundles_post_ra>
